<compile_context>
chip_gen: v7x
topology: tpu7x:2x2x1
jax: 0.10.0
libtpu: 0.0.40
codegen_flags: <defaults>
</compile_context>

<pallas_src>
import functools

import jax
import jax.numpy as jnp
from jax import lax
from jax.experimental import pallas as pl
from jax.experimental.pallas import tpu as pltpu

BN_EPS = 1e-5


# ----------------------------------------------------------------------------
# Pallas kernel: all four inception branches for a pack of batch elements.
# ----------------------------------------------------------------------------
def _mtc_kernel(x_ref,
                wh_ref, bh_ref,          # fused 1x1 heads (branches 1/2/3)
                w2_ref, b2_ref,          # stacked 3-tap conv  (K*Cmid, Cout)
                w3_ref, b3_ref,          # stacked 5-tap conv  (K*Cmid, Cout)
                w4_ref, b4_ref,          # maxpool-branch 1x1 conv
                o_ref,
                *, seq_len, c1, c2m, c3m):
    x = x_ref[...]                          # (R, Cin) f32, R = nb * L
    R = x.shape[0]
    L = seq_len

    # Position of every row inside its own sequence (rows are batch-major).
    t = lax.broadcasted_iota(jnp.int32, (R, 1), 0) % L

    def shifted(a, d, fill):
        """shifted[t] = a[t - d] within each sequence, `fill` outside."""
        if d == 0:
            return a
        rolled = pltpu.roll(a, d % R, axis=0)        # XLU sublane rotate, no copy
        valid = jnp.logical_and(t >= d, t <= L - 1 + d)   # 0 <= t - d < L
        return jnp.where(valid, rolled, fill)

    def mm_bias(a, w_ref, b_ref):
        # bf16 operands -> MXU-native, f32 accumulation, f32 bias add.
        return jnp.dot(a.astype(jnp.bfloat16), w_ref[...],
                       preferred_element_type=jnp.float32) + b_ref[...]

    # --- fused 1x1 heads of branches 1/2/3 (single MXU pass) + BN + ReLU ----
    h = jnp.maximum(mm_bias(x, wh_ref, bh_ref), 0.0)     # (R, c1+c2m+c3m) f32
    y1 = h[:, :c1]
    h2 = h[:, c1:c1 + c2m]
    h3 = h[:, c1 + c2m:c1 + c2m + c3m]

    # --- branch 2: 3-tap conv (pad=1) as one stacked-K matmul ----------------
    h2s = jnp.concatenate([shifted(h2, 1, 0.0), h2, shifted(h2, -1, 0.0)],
                          axis=-1)                       # (R, 3*c2m)
    y2 = jnp.maximum(mm_bias(h2s, w2_ref, b2_ref), 0.0)

    # --- branch 3: 5-tap conv (pad=2) as one stacked-K matmul ----------------
    h3s = jnp.concatenate([shifted(h3, d, 0.0) for d in (2, 1, 0, -1, -2)],
                          axis=-1)                       # (R, 5*c3m)
    y3 = jnp.maximum(mm_bias(h3s, w3_ref, b3_ref), 0.0)

    # --- branch 4: maxpool(k=3, stride=1, pad=1) -> 1x1 conv + BN + ReLU -----
    neg_inf = jnp.float32(-jnp.inf)
    xm = jnp.maximum(jnp.maximum(shifted(x, 1, neg_inf), x),
                     shifted(x, -1, neg_inf))
    y4 = jnp.maximum(mm_bias(xm, w4_ref, b4_ref), 0.0)

    o_ref[...] = jnp.concatenate([y1, y2, y3, y4], axis=-1).astype(o_ref.dtype)


# ----------------------------------------------------------------------------
# Wrapper
# ----------------------------------------------------------------------------
def mtc_forward(x_ncl, kp, *, nb=None):
    """x_ncl: (N, Cin, L) float32.  kp: dict of fused kernel-layout params."""
    N, Cin, L = x_ncl.shape
    x_rows = jnp.transpose(x_ncl, (0, 2, 1)).reshape(N * L, Cin)

    c1, c2m, c3m = kp["c1"], kp["c2m"], kp["c3m"]
    c2o = kp["w2b"].shape[-1]
    c3o = kp["w3b"].shape[-1]
    c4 = kp["w4"].shape[-1]
    c_out = c1 + c2o + c3o + c4

    if nb is None:
        # Pack as many batch elements per grid step as keeps the row tile
        # modest (amortizes the ~0.35us per-step overhead on small shapes).
        nb = 1
        for cand in range(N, 0, -1):
            if N % cand == 0 and cand * L <= 2048:
                nb = cand
                break
    assert N % nb == 0 and (nb * L) % 8 == 0, (N, nb, L)

    weights = [kp["w_head"], kp["b_head"], kp["w2b"], kp["b2b"],
               kp["w3b"], kp["b3b"], kp["w4"], kp["b4"]]

    def full_spec(a):
        nd = a.ndim
        return pl.BlockSpec(a.shape, lambda n, _nd=nd: (0,) * _nd)

    grid_spec = pltpu.PrefetchScalarGridSpec(
        num_scalar_prefetch=0,
        grid=(N // nb,),
        in_specs=[pl.BlockSpec((nb * L, Cin), lambda n: (n, 0))]
        + [full_spec(w) for w in weights],
        out_specs=pl.BlockSpec((nb * L, c_out), lambda n: (n, 0)),
    )

    kernel = functools.partial(_mtc_kernel, seq_len=L, c1=c1, c2m=c2m, c3m=c3m)

    y_rows = pl.pallas_call(
        kernel,
        out_shape=jax.ShapeDtypeStruct((N * L, c_out), jnp.float32),
        grid_spec=grid_spec,
        compiler_params=pltpu.CompilerParams(
            dimension_semantics=("parallel",),
            vmem_limit_bytes=64 * 1024 * 1024),
    )(x_rows, *weights)

    return jnp.transpose(y_rows.reshape(N, L, c_out), (0, 2, 1))   # back to NCL


# ----------------------------------------------------------------------------
# Deterministic parameter construction + BN folding + kernel-layout fusion
# ----------------------------------------------------------------------------
def _fold_bn(w, b, gamma, beta, mean, var):
    """w: (Cout, Cin, K) torch layout. Returns BN-folded (w, b)."""
    s = gamma / jnp.sqrt(var + BN_EPS)
    return w * s[:, None, None], (b - mean) * s + beta


def make_params(key, cin, c1, c2, c3, c4):
    keys = iter(jax.random.split(key, 64))

    def conv_w(cout, cin_, k):
        return 0.1 * jax.random.normal(next(keys), (cout, cin_, k), jnp.float32)

    def conv_b(cout):
        return 0.1 * jax.random.normal(next(keys), (cout,), jnp.float32)

    def bn(cout):
        gamma = 1.0 + 0.1 * jax.random.normal(next(keys), (cout,), jnp.float32)
        beta = 0.1 * jax.random.normal(next(keys), (cout,), jnp.float32)
        mean = 0.1 * jax.random.normal(next(keys), (cout,), jnp.float32)
        var = 0.5 + jnp.abs(0.2 * jax.random.normal(next(keys), (cout,),
                                                    jnp.float32))
        return gamma, beta, mean, var

    P = {
        "w1": conv_w(c1, cin, 1), "b1": conv_b(c1), "bn1": bn(c1),
        "w2a": conv_w(c2[0], cin, 1), "b2a": conv_b(c2[0]), "bn2a": bn(c2[0]),
        "w2b": conv_w(c2[1], c2[0], 3), "b2b": conv_b(c2[1]), "bn2b": bn(c2[1]),
        "w3a": conv_w(c3[0], cin, 1), "b3a": conv_b(c3[0]), "bn3a": bn(c3[0]),
        "w3b": conv_w(c3[1], c3[0], 5), "b3b": conv_b(c3[1]), "bn3b": bn(c3[1]),
        "w4": conv_w(c4, cin, 1), "b4": conv_b(c4), "bn4": bn(c4),
    }

    # Fold BN (f32), convert to kernel layout, fuse heads, cast weights bf16.
    def pointwise(w, b, bnp):
        wf, bf = _fold_bn(w, b, *bnp)
        return wf[:, :, 0].T, bf[None, :]                  # (Cin,Cout), (1,Cout)

    def tapped(w, b, bnp):
        wf, bf = _fold_bn(w, b, *bnp)
        K, ci, co = wf.shape[2], wf.shape[1], wf.shape[0]
        # (K, Cin, Cout) -> (K*Cin, Cout), k-major (matches kernel stacking).
        return jnp.transpose(wf, (2, 1, 0)).reshape(K * ci, co), bf[None, :]

    w1, b1 = pointwise(P["w1"], P["b1"], P["bn1"])
    w2a, b2a = pointwise(P["w2a"], P["b2a"], P["bn2a"])
    w3a, b3a = pointwise(P["w3a"], P["b3a"], P["bn3a"])
    w2b, b2b = tapped(P["w2b"], P["b2b"], P["bn2b"])
    w3b, b3b = tapped(P["w3b"], P["b3b"], P["bn3b"])
    w4, b4 = pointwise(P["w4"], P["b4"], P["bn4"])

    bf16 = jnp.bfloat16
    kp = {
        "c1": c1, "c2m": c2[0], "c3m": c3[0],
        "w_head": jnp.concatenate([w1, w2a, w3a], axis=1).astype(bf16),
        "b_head": jnp.concatenate([b1, b2a, b3a], axis=1),      # f32
        "w2b": w2b.astype(bf16), "b2b": b2b,
        "w3b": w3b.astype(bf16), "b3b": b3b,
        "w4": w4.astype(bf16), "b4": b4,
    }
    return P, kp


# ----------------------------------------------------------------------------
# Pure-JAX reference (lax.conv + eval-mode BN), independent of the kernel math
# ----------------------------------------------------------------------------
def mtc_reference(x, P):
    def bn_relu(y, bnp):
        g, b, m, v = bnp
        y = (y - m[None, :, None]) / jnp.sqrt(v[None, :, None] + BN_EPS)
        return jnp.maximum(y * g[None, :, None] + b[None, :, None], 0.0)

    def conv(x_, w, b, pad):
        y = lax.conv_general_dilated(x_, w, (1,), [(pad, pad)],
                                     dimension_numbers=("NCH", "OIH", "NCH"))
        return y + b[None, :, None]

    x1 = bn_relu(conv(x, P["w1"], P["b1"], 0), P["bn1"])
    h2 = bn_relu(conv(x, P["w2a"], P["b2a"], 0), P["bn2a"])
    x2 = bn_relu(conv(h2, P["w2b"], P["b2b"], 1), P["bn2b"])
    h3 = bn_relu(conv(x, P["w3a"], P["b3a"], 0), P["bn3a"])
    x3 = bn_relu(conv(h3, P["w3b"], P["b3b"], 2), P["bn3b"])
    xm = lax.reduce_window(x, -jnp.inf, lax.max, (1, 1, 3), (1, 1, 1),
                           [(0, 0), (0, 0), (1, 1)])
    x4 = bn_relu(conv(xm, P["w4"], P["b4"], 0), P["bn4"])
    return jnp.concatenate([x1, x2, x3, x4], axis=1)


# ----------------------------------------------------------------------------
if __name__ == "__main__":
    N, CIN, L = 2, 8, 16
    C1, C2, C3, C4 = 16, (16, 32), (16, 32), 16

    key = jax.random.PRNGKey(0)
    kx, kp_key = jax.random.split(key)
    x = jax.random.normal(kx, (N, CIN, L), jnp.float32)    # PyTorch NCL layout

    P, kp = make_params(kp_key, CIN, C1, C2, C3, C4)

    y = jax.block_until_ready(mtc_forward(x, kp))
    y_ref = jax.block_until_ready(mtc_reference(x, P))

    assert y.shape == (N, C1 + C2[1] + C3[1] + C4, L), y.shape
    # bf16 matmul operands (f32 accumulation) => loosened tolerance vs f32 ref.
    assert jnp.allclose(y, y_ref, atol=3e-2, rtol=3e-2), (
        float(jnp.max(jnp.abs(y - y_ref))))

    print("KERNEL_OK")
</pallas_src>

<mosaic_0001>
module attributes {stable_mosaic.version = 11 : i64} {
  func.func @_mtc_kernel(%arg0: i32, %arg1: memref<32x8xf32, #tpu.memory_space<vmem>>, %arg2: memref<8x48xbf16, #tpu.memory_space<vmem>>, %arg3: memref<1x48xf32, #tpu.memory_space<vmem>>, %arg4: memref<48x32xbf16, #tpu.memory_space<vmem>>, %arg5: memref<1x32xf32, #tpu.memory_space<vmem>>, %arg6: memref<80x32xbf16, #tpu.memory_space<vmem>>, %arg7: memref<1x32xf32, #tpu.memory_space<vmem>>, %arg8: memref<8x16xbf16, #tpu.memory_space<vmem>>, %arg9: memref<1x16xf32, #tpu.memory_space<vmem>>, %arg10: memref<32x96xf32, #tpu.memory_space<vmem>>) attributes {dimension_semantics = [#tpu.dimension_semantics<parallel>], iteration_bounds = array<i64: 1>, scalar_prefetch = 0 : i64, scratch_operands = 0 : i64, tpu.core_type = #tpu.core_type<tc>, window_params = [{transform_indices = @transform_0, window_bounds = array<i64: 32, 8>}, {pipeline_mode = #tpu.pipeline_mode<synchronous>, transform_indices = @transform_1, window_bounds = array<i64: 8, 48>}, {pipeline_mode = #tpu.pipeline_mode<synchronous>, transform_indices = @transform_2, window_bounds = array<i64: 1, 48>}, {pipeline_mode = #tpu.pipeline_mode<synchronous>, transform_indices = @transform_3, window_bounds = array<i64: 48, 32>}, {pipeline_mode = #tpu.pipeline_mode<synchronous>, transform_indices = @transform_4, window_bounds = array<i64: 1, 32>}, {pipeline_mode = #tpu.pipeline_mode<synchronous>, transform_indices = @transform_5, window_bounds = array<i64: 80, 32>}, {pipeline_mode = #tpu.pipeline_mode<synchronous>, transform_indices = @transform_6, window_bounds = array<i64: 1, 32>}, {pipeline_mode = #tpu.pipeline_mode<synchronous>, transform_indices = @transform_7, window_bounds = array<i64: 8, 16>}, {pipeline_mode = #tpu.pipeline_mode<synchronous>, transform_indices = @transform_8, window_bounds = array<i64: 1, 16>}, {transform_indices = @transform_9, window_bounds = array<i64: 32, 96>}]} {
    %c0 = arith.constant 0 : index
    %c0_0 = arith.constant 0 : index
    %0 = vector.load %arg1[%c0, %c0_0] : memref<32x8xf32, #tpu.memory_space<vmem>>, vector<32x8xf32>
    %1 = tpu.iota {dimensions = array<i32: 0>} : vector<32x1xi32>
    %c16_i32 = arith.constant 16 : i32
    %c0_i32 = arith.constant 0 : i32
    %2 = arith.cmpi eq, %c16_i32, %c0_i32 : i32
    %c1_i32 = arith.constant 1 : i32
    %3 = arith.select %2, %c1_i32, %c16_i32 : i32
    %4 = vector.broadcast %3 : i32 to vector<32x1xi32>
    %5 = arith.remsi %1, %4 : vector<32x1xi32>
    %c0_i32_1 = arith.constant 0 : i32
    %6 = vector.broadcast %c0_i32_1 : i32 to vector<32x1xi32>
    %7 = arith.cmpi ne, %5, %6 : vector<32x1xi32>
    %c0_i32_2 = arith.constant 0 : i32
    %8 = vector.broadcast %c0_i32_2 : i32 to vector<32x1xi32>
    %9 = arith.cmpi slt, %5, %8 : vector<32x1xi32>
    %c0_i32_3 = arith.constant 0 : i32
    %10 = arith.cmpi slt, %3, %c0_i32_3 : i32
    %11 = vector.broadcast %10 : i1 to vector<32x1xi1>
    %12 = vector.broadcast %11 : vector<32x1xi1> to vector<32x1xi1>
    %13 = arith.xori %9, %12 : vector<32x1xi1>
    %14 = arith.andi %13, %7 : vector<32x1xi1>
    %15 = vector.broadcast %3 : i32 to vector<32x1xi32>
    %16 = arith.addi %5, %15 : vector<32x1xi32>
    %17 = arith.select %14, %16, %5 : vector<32x1xi1>, vector<32x1xi32>
    %18 = arith.truncf %0 : vector<32x8xf32> to vector<32x8xbf16>
    %c0_4 = arith.constant 0 : index
    %c0_5 = arith.constant 0 : index
    %19 = vector.load %arg2[%c0_4, %c0_5] : memref<8x48xbf16, #tpu.memory_space<vmem>>, vector<8x48xbf16>
    %cst = arith.constant dense<0.000000e+00> : vector<32x48xf32>
    %20 = tpu.matmul %18, %19, %cst {dimension_numbers = #tpu.dot_dimension_numbers<[1], [0], [0], [1], [0, 0, 1, 1], [], []>} : vector<32x8xbf16>, vector<8x48xbf16>, vector<32x48xf32> -> vector<32x48xf32>
    %c0_6 = arith.constant 0 : index
    %c0_7 = arith.constant 0 : index
    %21 = vector.load %arg3[%c0_6, %c0_7] : memref<1x48xf32, #tpu.memory_space<vmem>>, vector<1x48xf32>
    %22 = vector.broadcast %21 : vector<1x48xf32> to vector<32x48xf32>
    %23 = arith.addf %20, %22 : vector<32x48xf32>
    %cst_8 = arith.constant 0.000000e+00 : f32
    %24 = vector.broadcast %cst_8 : f32 to vector<32x48xf32>
    %25 = arith.maximumf %23, %24 : vector<32x48xf32>
    %26 = vector.extract_strided_slice %25 {offsets = [0, 0], sizes = [32, 16], strides = [1, 1]} : vector<32x48xf32> to vector<32x16xf32>
    %27 = vector.extract_strided_slice %25 {offsets = [0, 16], sizes = [32, 16], strides = [1, 1]} : vector<32x48xf32> to vector<32x16xf32>
    %28 = vector.extract_strided_slice %25 {offsets = [0, 32], sizes = [32, 16], strides = [1, 1]} : vector<32x48xf32> to vector<32x16xf32>
    %c1_i32_9 = arith.constant 1 : i32
    %29 = tpu.dynamic_rotate %27 by %c1_i32_9 dim 0 : vector<32x16xf32>, i32 -> vector<32x16xf32>
    %c1_i32_10 = arith.constant 1 : i32
    %30 = vector.broadcast %c1_i32_10 : i32 to vector<32x1xi32>
    %31 = arith.cmpi sge, %17, %30 : vector<32x1xi32>
    %c16_i32_11 = arith.constant 16 : i32
    %32 = vector.broadcast %c16_i32_11 : i32 to vector<32x1xi32>
    %33 = arith.cmpi sle, %17, %32 : vector<32x1xi32>
    %34 = arith.andi %31, %33 : vector<32x1xi1>
    %cst_12 = arith.constant 0.000000e+00 : f32
    %35 = vector.shape_cast %34 : vector<32x1xi1> to vector<32x1xi1>
    %36 = vector.broadcast %35 : vector<32x1xi1> to vector<32x16xi1>
    %37 = vector.broadcast %cst_12 : f32 to vector<32x16xf32>
    %38 = arith.select %36, %29, %37 : vector<32x16xi1>, vector<32x16xf32>
    %c31_i32 = arith.constant 31 : i32
    %39 = tpu.dynamic_rotate %27 by %c31_i32 dim 0 : vector<32x16xf32>, i32 -> vector<32x16xf32>
    %c-1_i32 = arith.constant -1 : i32
    %40 = vector.broadcast %c-1_i32 : i32 to vector<32x1xi32>
    %41 = arith.cmpi sge, %17, %40 : vector<32x1xi32>
    %c14_i32 = arith.constant 14 : i32
    %42 = vector.broadcast %c14_i32 : i32 to vector<32x1xi32>
    %43 = arith.cmpi sle, %17, %42 : vector<32x1xi32>
    %44 = arith.andi %41, %43 : vector<32x1xi1>
    %cst_13 = arith.constant 0.000000e+00 : f32
    %45 = vector.shape_cast %44 : vector<32x1xi1> to vector<32x1xi1>
    %46 = vector.broadcast %45 : vector<32x1xi1> to vector<32x16xi1>
    %47 = vector.broadcast %cst_13 : f32 to vector<32x16xf32>
    %48 = arith.select %46, %39, %47 : vector<32x16xi1>, vector<32x16xf32>
    %49 = tpu.concatenate %38, %27, %48 in 1 : vector<32x16xf32>, vector<32x16xf32>, vector<32x16xf32> -> vector<32x48xf32>
    %50 = arith.truncf %49 : vector<32x48xf32> to vector<32x48xbf16>
    %c0_14 = arith.constant 0 : index
    %c0_15 = arith.constant 0 : index
    %51 = vector.load %arg4[%c0_14, %c0_15] : memref<48x32xbf16, #tpu.memory_space<vmem>>, vector<48x32xbf16>
    %cst_16 = arith.constant dense<0.000000e+00> : vector<32x32xf32>
    %52 = tpu.matmul %50, %51, %cst_16 {dimension_numbers = #tpu.dot_dimension_numbers<[1], [0], [0], [1], [0, 0, 1, 1], [], []>} : vector<32x48xbf16>, vector<48x32xbf16>, vector<32x32xf32> -> vector<32x32xf32>
    %c0_17 = arith.constant 0 : index
    %c0_18 = arith.constant 0 : index
    %53 = vector.load %arg5[%c0_17, %c0_18] : memref<1x32xf32, #tpu.memory_space<vmem>>, vector<1x32xf32>
    %54 = vector.broadcast %53 : vector<1x32xf32> to vector<32x32xf32>
    %55 = arith.addf %52, %54 : vector<32x32xf32>
    %cst_19 = arith.constant 0.000000e+00 : f32
    %56 = vector.broadcast %cst_19 : f32 to vector<32x32xf32>
    %57 = arith.maximumf %55, %56 : vector<32x32xf32>
    %c2_i32 = arith.constant 2 : i32
    %58 = tpu.dynamic_rotate %28 by %c2_i32 dim 0 : vector<32x16xf32>, i32 -> vector<32x16xf32>
    %c2_i32_20 = arith.constant 2 : i32
    %59 = vector.broadcast %c2_i32_20 : i32 to vector<32x1xi32>
    %60 = arith.cmpi sge, %17, %59 : vector<32x1xi32>
    %c17_i32 = arith.constant 17 : i32
    %61 = vector.broadcast %c17_i32 : i32 to vector<32x1xi32>
    %62 = arith.cmpi sle, %17, %61 : vector<32x1xi32>
    %63 = arith.andi %60, %62 : vector<32x1xi1>
    %cst_21 = arith.constant 0.000000e+00 : f32
    %64 = vector.shape_cast %63 : vector<32x1xi1> to vector<32x1xi1>
    %65 = vector.broadcast %64 : vector<32x1xi1> to vector<32x16xi1>
    %66 = vector.broadcast %cst_21 : f32 to vector<32x16xf32>
    %67 = arith.select %65, %58, %66 : vector<32x16xi1>, vector<32x16xf32>
    %c1_i32_22 = arith.constant 1 : i32
    %68 = tpu.dynamic_rotate %28 by %c1_i32_22 dim 0 : vector<32x16xf32>, i32 -> vector<32x16xf32>
    %c1_i32_23 = arith.constant 1 : i32
    %69 = vector.broadcast %c1_i32_23 : i32 to vector<32x1xi32>
    %70 = arith.cmpi sge, %17, %69 : vector<32x1xi32>
    %c16_i32_24 = arith.constant 16 : i32
    %71 = vector.broadcast %c16_i32_24 : i32 to vector<32x1xi32>
    %72 = arith.cmpi sle, %17, %71 : vector<32x1xi32>
    %73 = arith.andi %70, %72 : vector<32x1xi1>
    %cst_25 = arith.constant 0.000000e+00 : f32
    %74 = vector.shape_cast %73 : vector<32x1xi1> to vector<32x1xi1>
    %75 = vector.broadcast %74 : vector<32x1xi1> to vector<32x16xi1>
    %76 = vector.broadcast %cst_25 : f32 to vector<32x16xf32>
    %77 = arith.select %75, %68, %76 : vector<32x16xi1>, vector<32x16xf32>
    %c31_i32_26 = arith.constant 31 : i32
    %78 = tpu.dynamic_rotate %28 by %c31_i32_26 dim 0 : vector<32x16xf32>, i32 -> vector<32x16xf32>
    %c-1_i32_27 = arith.constant -1 : i32
    %79 = vector.broadcast %c-1_i32_27 : i32 to vector<32x1xi32>
    %80 = arith.cmpi sge, %17, %79 : vector<32x1xi32>
    %c14_i32_28 = arith.constant 14 : i32
    %81 = vector.broadcast %c14_i32_28 : i32 to vector<32x1xi32>
    %82 = arith.cmpi sle, %17, %81 : vector<32x1xi32>
    %83 = arith.andi %80, %82 : vector<32x1xi1>
    %cst_29 = arith.constant 0.000000e+00 : f32
    %84 = vector.shape_cast %83 : vector<32x1xi1> to vector<32x1xi1>
    %85 = vector.broadcast %84 : vector<32x1xi1> to vector<32x16xi1>
    %86 = vector.broadcast %cst_29 : f32 to vector<32x16xf32>
    %87 = arith.select %85, %78, %86 : vector<32x16xi1>, vector<32x16xf32>
    %c30_i32 = arith.constant 30 : i32
    %88 = tpu.dynamic_rotate %28 by %c30_i32 dim 0 : vector<32x16xf32>, i32 -> vector<32x16xf32>
    %c-2_i32 = arith.constant -2 : i32
    %89 = vector.broadcast %c-2_i32 : i32 to vector<32x1xi32>
    %90 = arith.cmpi sge, %17, %89 : vector<32x1xi32>
    %c13_i32 = arith.constant 13 : i32
    %91 = vector.broadcast %c13_i32 : i32 to vector<32x1xi32>
    %92 = arith.cmpi sle, %17, %91 : vector<32x1xi32>
    %93 = arith.andi %90, %92 : vector<32x1xi1>
    %cst_30 = arith.constant 0.000000e+00 : f32
    %94 = vector.shape_cast %93 : vector<32x1xi1> to vector<32x1xi1>
    %95 = vector.broadcast %94 : vector<32x1xi1> to vector<32x16xi1>
    %96 = vector.broadcast %cst_30 : f32 to vector<32x16xf32>
    %97 = arith.select %95, %88, %96 : vector<32x16xi1>, vector<32x16xf32>
    %98 = tpu.concatenate %67, %77, %28, %87, %97 in 1 : vector<32x16xf32>, vector<32x16xf32>, vector<32x16xf32>, vector<32x16xf32>, vector<32x16xf32> -> vector<32x80xf32>
    %99 = arith.truncf %98 : vector<32x80xf32> to vector<32x80xbf16>
    %c0_31 = arith.constant 0 : index
    %c0_32 = arith.constant 0 : index
    %100 = vector.load %arg6[%c0_31, %c0_32] : memref<80x32xbf16, #tpu.memory_space<vmem>>, vector<80x32xbf16>
    %cst_33 = arith.constant dense<0.000000e+00> : vector<32x32xf32>
    %101 = tpu.matmul %99, %100, %cst_33 {dimension_numbers = #tpu.dot_dimension_numbers<[1], [0], [0], [1], [0, 0, 1, 1], [], []>} : vector<32x80xbf16>, vector<80x32xbf16>, vector<32x32xf32> -> vector<32x32xf32>
    %c0_34 = arith.constant 0 : index
    %c0_35 = arith.constant 0 : index
    %102 = vector.load %arg7[%c0_34, %c0_35] : memref<1x32xf32, #tpu.memory_space<vmem>>, vector<1x32xf32>
    %103 = vector.broadcast %102 : vector<1x32xf32> to vector<32x32xf32>
    %104 = arith.addf %101, %103 : vector<32x32xf32>
    %cst_36 = arith.constant 0.000000e+00 : f32
    %105 = vector.broadcast %cst_36 : f32 to vector<32x32xf32>
    %106 = arith.maximumf %104, %105 : vector<32x32xf32>
    %c1_i32_37 = arith.constant 1 : i32
    %107 = tpu.dynamic_rotate %0 by %c1_i32_37 dim 0 : vector<32x8xf32>, i32 -> vector<32x8xf32>
    %c1_i32_38 = arith.constant 1 : i32
    %108 = vector.broadcast %c1_i32_38 : i32 to vector<32x1xi32>
    %109 = arith.cmpi sge, %17, %108 : vector<32x1xi32>
    %c16_i32_39 = arith.constant 16 : i32
    %110 = vector.broadcast %c16_i32_39 : i32 to vector<32x1xi32>
    %111 = arith.cmpi sle, %17, %110 : vector<32x1xi32>
    %112 = arith.andi %109, %111 : vector<32x1xi1>
    %cst_40 = arith.constant 0xFF800000 : f32
    %113 = vector.shape_cast %112 : vector<32x1xi1> to vector<32x1xi1>
    %114 = vector.broadcast %113 : vector<32x1xi1> to vector<32x8xi1>
    %115 = vector.broadcast %cst_40 : f32 to vector<32x8xf32>
    %116 = arith.select %114, %107, %115 : vector<32x8xi1>, vector<32x8xf32>
    %117 = arith.maximumf %116, %0 : vector<32x8xf32>
    %c31_i32_41 = arith.constant 31 : i32
    %118 = tpu.dynamic_rotate %0 by %c31_i32_41 dim 0 : vector<32x8xf32>, i32 -> vector<32x8xf32>
    %c-1_i32_42 = arith.constant -1 : i32
    %119 = vector.broadcast %c-1_i32_42 : i32 to vector<32x1xi32>
    %120 = arith.cmpi sge, %17, %119 : vector<32x1xi32>
    %c14_i32_43 = arith.constant 14 : i32
    %121 = vector.broadcast %c14_i32_43 : i32 to vector<32x1xi32>
    %122 = arith.cmpi sle, %17, %121 : vector<32x1xi32>
    %123 = arith.andi %120, %122 : vector<32x1xi1>
    %cst_44 = arith.constant 0xFF800000 : f32
    %124 = vector.shape_cast %123 : vector<32x1xi1> to vector<32x1xi1>
    %125 = vector.broadcast %124 : vector<32x1xi1> to vector<32x8xi1>
    %126 = vector.broadcast %cst_44 : f32 to vector<32x8xf32>
    %127 = arith.select %125, %118, %126 : vector<32x8xi1>, vector<32x8xf32>
    %128 = arith.maximumf %117, %127 : vector<32x8xf32>
    %129 = arith.truncf %128 : vector<32x8xf32> to vector<32x8xbf16>
    %c0_45 = arith.constant 0 : index
    %c0_46 = arith.constant 0 : index
    %130 = vector.load %arg8[%c0_45, %c0_46] : memref<8x16xbf16, #tpu.memory_space<vmem>>, vector<8x16xbf16>
    %cst_47 = arith.constant dense<0.000000e+00> : vector<32x16xf32>
    %131 = tpu.matmul %129, %130, %cst_47 {dimension_numbers = #tpu.dot_dimension_numbers<[1], [0], [0], [1], [0, 0, 1, 1], [], []>} : vector<32x8xbf16>, vector<8x16xbf16>, vector<32x16xf32> -> vector<32x16xf32>
    %c0_48 = arith.constant 0 : index
    %c0_49 = arith.constant 0 : index
    %132 = vector.load %arg9[%c0_48, %c0_49] : memref<1x16xf32, #tpu.memory_space<vmem>>, vector<1x16xf32>
    %133 = vector.broadcast %132 : vector<1x16xf32> to vector<32x16xf32>
    %134 = arith.addf %131, %133 : vector<32x16xf32>
    %cst_50 = arith.constant 0.000000e+00 : f32
    %135 = vector.broadcast %cst_50 : f32 to vector<32x16xf32>
    %136 = arith.maximumf %134, %135 : vector<32x16xf32>
    %137 = tpu.concatenate %26, %57, %106, %136 in 1 : vector<32x16xf32>, vector<32x32xf32>, vector<32x32xf32>, vector<32x16xf32> -> vector<32x96xf32>
    %c0_51 = arith.constant 0 : index
    %c0_52 = arith.constant 0 : index
    %138 = vector.load %arg10[%c0_51, %c0_52] : memref<32x96xf32, #tpu.memory_space<vmem>>, vector<32x96xf32>
    tpu.vector_store %arg10[%c0_51, %c0_52], %137 {strides = array<i32>} : memref<32x96xf32, #tpu.memory_space<vmem>>, vector<32x96xf32>,
    return
  }
  func.func @transform_0(%arg0: i32) -> (i32, i32) {
    %c0_i32 = arith.constant 0 : i32
    %c0_i32_0 = arith.constant 0 : i32
    return %arg0, %c0_i32 : i32, i32
  }
  func.func @transform_1(%arg0: i32) -> (i32, i32) {
    %c0_i32 = arith.constant 0 : i32
    %c0_i32_0 = arith.constant 0 : i32
    %c0_i32_1 = arith.constant 0 : i32
    return %c0_i32, %c0_i32_0 : i32, i32
  }
  func.func @transform_2(%arg0: i32) -> (i32, i32) {
    %c0_i32 = arith.constant 0 : i32
    %c0_i32_0 = arith.constant 0 : i32
    %c0_i32_1 = arith.constant 0 : i32
    return %c0_i32, %c0_i32_0 : i32, i32
  }
  func.func @transform_3(%arg0: i32) -> (i32, i32) {
    %c0_i32 = arith.constant 0 : i32
    %c0_i32_0 = arith.constant 0 : i32
    %c0_i32_1 = arith.constant 0 : i32
    return %c0_i32, %c0_i32_0 : i32, i32
  }
  func.func @transform_4(%arg0: i32) -> (i32, i32) {
    %c0_i32 = arith.constant 0 : i32
    %c0_i32_0 = arith.constant 0 : i32
    %c0_i32_1 = arith.constant 0 : i32
    return %c0_i32, %c0_i32_0 : i32, i32
  }
  func.func @transform_5(%arg0: i32) -> (i32, i32) {
    %c0_i32 = arith.constant 0 : i32
    %c0_i32_0 = arith.constant 0 : i32
    %c0_i32_1 = arith.constant 0 : i32
    return %c0_i32, %c0_i32_0 : i32, i32
  }
  func.func @transform_6(%arg0: i32) -> (i32, i32) {
    %c0_i32 = arith.constant 0 : i32
    %c0_i32_0 = arith.constant 0 : i32
    %c0_i32_1 = arith.constant 0 : i32
    return %c0_i32, %c0_i32_0 : i32, i32
  }
  func.func @transform_7(%arg0: i32) -> (i32, i32) {
    %c0_i32 = arith.constant 0 : i32
    %c0_i32_0 = arith.constant 0 : i32
    %c0_i32_1 = arith.constant 0 : i32
    return %c0_i32, %c0_i32_0 : i32, i32
  }
  func.func @transform_8(%arg0: i32) -> (i32, i32) {
    %c0_i32 = arith.constant 0 : i32
    %c0_i32_0 = arith.constant 0 : i32
    %c0_i32_1 = arith.constant 0 : i32
    return %c0_i32, %c0_i32_0 : i32, i32
  }
  func.func @transform_9(%arg0: i32) -> (i32, i32) {
    %c0_i32 = arith.constant 0 : i32
    %c0_i32_0 = arith.constant 0 : i32
    return %arg0, %c0_i32 : i32, i32
  }
}

</mosaic_0001>

<bundles_post_ra>
// kernel: tpu_custom_call.1
= control target key start
LH: loop header
LB: loop body
LE: loop exit
PB: predicated region body
PF: predicated region fallthrough
CT: control target
= control target key end

     0   :  { %14 = vsyncpa [#allocation3], 0  ;;  %s1885_s0 = inlined_call_operand.hbm [shape: f32[32,8], index: 0, kind: input, shape index: {}]   ;;  %s1886_s1 = inlined_call_operand.hbm [shape: bf16[8,48], index: 1, kind: input, shape index: {}]   ;;  %s1887_s2 = inlined_call_operand.hbm [shape: f32[1,48], index: 2, kind: input, shape index: {}]   ;;  %s1888_s3 = inlined_call_operand.hbm [shape: bf16[48,32], index: 3, kind: input, shape index: {}]   ;;  %s1889_s4 = inlined_call_operand.hbm [shape: f32[1,32], index: 4, kind: input, shape index: {}]   ;;  %s1890_s5 = inlined_call_operand.hbm [shape: bf16[80,32], index: 5, kind: input, shape index: {}]   ;;  %s1891_s6 = inlined_call_operand.hbm [shape: f32[1,32], index: 6, kind: input, shape index: {}]   ;;  %s1892_s7 = inlined_call_operand.hbm [shape: bf16[8,16], index: 7, kind: input, shape index: {}]   ;;  %s1893_s8 = inlined_call_operand.hbm [shape: f32[1,16], index: 8, kind: input, shape index: {}]   ;;  %s1894_s9 = inlined_call_operand.hbm [shape: f32[32,96], index: 9, kind: output, shape index: {}]  }
   0x1   :  { %15 = vsyncpa [#allocation6], 0 }
   0x2   :  { %16 = vsyncpa [#allocation9], 0 }
   0x3   :  { %17 = vsyncpa [#allocation12], 0 }
   0x4   :  { %18 = vsyncpa [#allocation15], 0 }
   0x5   :  { %19 = vsyncpa [#allocation4], 0  ;;  %s1338_s30 = smov [#allocation5]   ;;  %s1339_s11 = smov [#allocation8]  }
   0x6   :  { %s38_s10 = sshll.u32 %s1338_s30, 4  ;;  %s57_s12 = sshll.u32 %s1339_s11, 4  ;;  %s39_s10 = int_to_ptr.vmem [resolvable:$true] %s38_s10  ;;  %s1408_s12 = int_to_ptr.vmem [resolvable:$true] %s57_s12 }
   0x7   :  { %s1106_s15 = scalar_lea.hbm %s1886_s1, 64 }
   0x8   :  { %p1107_p0 = scmp.ne.s32.totalorder %s1886_s1, %s1106_s15  ;;  %p1110_p1 = scmp.lt.u32.totalorder %s1106_s15, %s1886_s1 }
   0xa   :  { %p1112_p2 = pnand %p1110_p1, %p1107_p0 }
   0xc   :  { %1115 = shalt.err (!%p1112_p2)
}
   0xd   :  { %s1116_s20 = scalar_lea.vmem %s39_s10, 64  ;;  %p1121_p4 = scmp.lt.s32.totalorder %s39_s10, %s39_s10 }
   0xe   :  { %p1117_p3 = scmp.ne.s32.totalorder %s39_s10, %s1116_s20  ;;  %p1122_p5 = scmp.lt.s32.totalorder %s1116_s20, %s1116_s20 }
  0x10   :  { %p1123_p6 = por %p1122_p5, %p1121_p4 }
  0x12   :  { %p1124_p7 = pnand %p1123_p6, %p1117_p3 }
  0x14   :  { %1127 = shalt.err (!%p1124_p7)
}
  0x15   :  { %41 = dma.hbm_to_vmem [thread:$0]  %s1886_s1, 64, %s39_s10, [#allocation6]  }
  0x16   :  { %s1128_s25 = scalar_lea.hbm %s1888_s3, 384 }
  0x17   :  { %p1129_p8 = scmp.ne.s32.totalorder %s1888_s3, %s1128_s25  ;;  %p1132_p9 = scmp.lt.u32.totalorder %s1128_s25, %s1888_s3 }
  0x19   :  { %p1134_p10 = pnand %p1132_p9, %p1129_p8 }
  0x1b   :  { %1137 = shalt.err (!%p1134_p10)
}
  0x1c   :  { %s1138_s30 = scalar_lea.vmem %s1408_s12, 384  ;;  %p1143_p12 = scmp.lt.s32.totalorder %s1408_s12, %s1408_s12 }
  0x1d   :  { %p1139_p11 = scmp.ne.s32.totalorder %s1408_s12, %s1138_s30  ;;  %p1144_p13 = scmp.lt.s32.totalorder %s1138_s30, %s1138_s30 }
  0x1f   :  { %p1145_p0 = por %p1144_p13, %p1143_p12 }
  0x21   :  { %p1146_p1 = pnand %p1145_p0, %p1139_p11 }
  0x23   :  { %1149 = shalt.err (!%p1146_p1)
}
  0x24   :  { %s1340_s1 = smov 64   ;;  %s1341_s10 = smov 4  }
  0x25   :  { %63 = dma.hbm_to_vmem [thread:$0]  %s1888_s3, 384, %s1408_s12, [#allocation9], %s1340_s1, %s1340_s1, %s1341_s10  }
  0x26   :  { %s1342_s14 = smov [#allocation11]   ;;  %s1343_s16 = smov [#allocation14]  }
  0x27   :  { %s79_s15 = sshll.u32 %s1342_s14, 4  ;;  %s102_s17 = sshll.u32 %s1343_s16, 4  ;;  %s80_s15 = int_to_ptr.vmem [resolvable:$true] %s79_s15  ;;  %s103_s17 = int_to_ptr.vmem [resolvable:$true] %s102_s17 }
  0x28   :  { %s1150_s20 = scalar_lea.hbm %s1890_s5, 640 }
  0x29   :  { %p1151_p2 = scmp.ne.s32.totalorder %s1890_s5, %s1150_s20  ;;  %p1154_p3 = scmp.lt.u32.totalorder %s1150_s20, %s1890_s5 }
  0x2b   :  { %p1156_p4 = pnand %p1154_p3, %p1151_p2 }
  0x2d   :  { %1159 = shalt.err (!%p1156_p4)
}
  0x2e   :  { %s1160_s3 = scalar_lea.vmem %s80_s15, 640  ;;  %p1165_p6 = scmp.lt.s32.totalorder %s80_s15, %s80_s15 }
  0x2f   :  { %p1161_p5 = scmp.ne.s32.totalorder %s80_s15, %s1160_s3  ;;  %p1166_p7 = scmp.lt.s32.totalorder %s1160_s3, %s1160_s3 }
  0x31   :  { %p1167_p8 = por %p1166_p7, %p1165_p6 }
  0x33   :  { %p1168_p9 = pnand %p1167_p8, %p1161_p5 }
  0x35   :  { %1171 = shalt.err (!%p1168_p9)
}
  0x36   :  { %85 = dma.hbm_to_vmem [thread:$0]  %s1890_s5, 640, %s80_s15, [#allocation12], %s1340_s1, %s1340_s1, %s1341_s10  }
  0x37   :  { %s1172_s28 = scalar_lea.hbm %s1892_s7, 64 }
  0x38   :  { %p1173_p10 = scmp.ne.s32.totalorder %s1892_s7, %s1172_s28  ;;  %p1176_p11 = scmp.lt.u32.totalorder %s1172_s28, %s1892_s7 }
  0x3a   :  { %p1178_p12 = pnand %p1176_p11, %p1173_p10 }
  0x3c   :  { %1181 = shalt.err (!%p1178_p12)
}
  0x3d   :  { %s1182_s14 = scalar_lea.vmem %s103_s17, 64  ;;  %p1187_p0 = scmp.lt.s32.totalorder %s103_s17, %s103_s17 }
  0x3e   :  { %p1183_p13 = scmp.ne.s32.totalorder %s103_s17, %s1182_s14  ;;  %p1188_p1 = scmp.lt.s32.totalorder %s1182_s14, %s1182_s14 }
  0x40   :  { %p1189_p2 = por %p1188_p1, %p1187_p0 }
  0x42   :  { %p1190_p3 = pnand %p1189_p2, %p1183_p13 }
  0x44   :  { %1193 = shalt.err (!%p1190_p3)
}
  0x45   :  { %105 = dma.hbm_to_vmem [thread:$0]  %s1892_s7, 64, %s103_s17, [#allocation15]  }
  0x46   :  { %s1344_s15 = smov [#allocation2]   ;;  %s1194_s20 = scalar_lea.hbm %s1885_s0, 512 }
  0x47   :  { %s25_s16 = sshll.u32 %s1344_s15, 4  ;;  %p1195_p4 = scmp.ne.s32.totalorder %s1885_s0, %s1194_s20  ;;  %s26_s16 = int_to_ptr.vmem [resolvable:$true] %s25_s16 }
  0x48   :  { %p1198_p5 = scmp.lt.u32.totalorder %s1194_s20, %s1885_s0 }
  0x4a   :  { %p1200_p6 = pnand %p1198_p5, %p1195_p4 }
  0x4c   :  { %1203 = shalt.err (!%p1200_p6)
}
  0x4d   :  { %s1204_s3 = scalar_lea.vmem %s26_s16, 512  ;;  %p1209_p8 = scmp.lt.s32.totalorder %s26_s16, %s26_s16 }
  0x4e   :  { %p1205_p7 = scmp.ne.s32.totalorder %s26_s16, %s1204_s3  ;;  %p1210_p9 = scmp.lt.s32.totalorder %s1204_s3, %s1204_s3 }
  0x50   :  { %p1211_p10 = por %p1210_p9, %p1209_p8 }
  0x52   :  { %p1212_p11 = pnand %p1211_p10, %p1205_p7 }
  0x54   :  { %1215 = shalt.err (!%p1212_p11)
}
  0x55   :  { %s1345_s7 = smov 128   ;;  %s1346_s17 = smov 8  }
  0x56   :  { %31 = dma.hbm_to_vmem [thread:$0]  %s1885_s0, 512, %s26_s16, [#allocation3], %s1345_s7, %s1345_s7, %s1346_s17  }
  0x57   :  { %s1347_s26 = smov [#allocation7]   ;;  %s1348_s28 = smov [#allocation10]  }
  0x58   :  { %s48_s27 = sshll.u32 %s1347_s26, 4  ;;  %s70_s29 = sshll.u32 %s1348_s28, 4  ;;  %s49_s27 = int_to_ptr.vmem [resolvable:$true] %s48_s27  ;;  %s71_s29 = int_to_ptr.vmem [resolvable:$true] %s70_s29 }
  0x59   :  { %s1216_s13 = scalar_lea.hbm %s1887_s2, 16 }
  0x5a   :  { %p1217_p12 = scmp.ne.s32.totalorder %s1887_s2, %s1216_s13  ;;  %p1220_p13 = scmp.lt.u32.totalorder %s1216_s13, %s1887_s2 }
  0x5c   :  { %p1222_p0 = pnand %p1220_p13, %p1217_p12 }
  0x5e   :  { %1225 = shalt.err (!%p1222_p0)
}
  0x5f   :  { %s1226_s0 = scalar_lea.vmem %s49_s27, 16  ;;  %s1230_s16 = scalar_lea.vmem %s49_s27, 32 }
  0x60   :  { %p1227_p1 = scmp.ne.s32.totalorder %s49_s27, %s1226_s0  ;;  %p1231_p2 = scmp.lt.s32.totalorder %s49_s27, %s49_s27 }
  0x61   :  { %p1232_p3 = scmp.lt.s32.totalorder %s1230_s16, %s1226_s0 }
  0x63   :  { %p1233_p4 = por %p1232_p3, %p1231_p2 }
  0x65   :  { %p1234_p5 = pnand %p1233_p4, %p1227_p1 }
  0x67   :  { %1237 = shalt.err (!%p1234_p5)
}
  0x68   :  { %51 = dma.hbm_to_vmem [thread:$0]  %s1887_s2, 16, %s49_s27, [#allocation6]  }
  0x69   :  { %s1238_s22 = scalar_lea.hbm %s1889_s4, 16 }
  0x6a   :  { %p1239_p6 = scmp.ne.s32.totalorder %s1889_s4, %s1238_s22  ;;  %p1242_p7 = scmp.lt.u32.totalorder %s1238_s22, %s1889_s4 }
  0x6c   :  { %p1244_p8 = pnand %p1242_p7, %p1239_p6 }
  0x6e   :  { %1247 = shalt.err (!%p1244_p8)
}
  0x6f   :  { %s1248_s25 = scalar_lea.vmem %s71_s29, 16  ;;  %s1252_s26 = scalar_lea.vmem %s71_s29, 32 }
  0x70   :  { %p1249_p9 = scmp.ne.s32.totalorder %s71_s29, %s1248_s25  ;;  %p1253_p10 = scmp.lt.s32.totalorder %s71_s29, %s71_s29 }
  0x71   :  { %p1254_p11 = scmp.lt.s32.totalorder %s1252_s26, %s1248_s25 }
  0x73   :  { %p1255_p12 = por %p1254_p11, %p1253_p10 }
  0x75   :  { %p1256_p13 = pnand %p1255_p12, %p1249_p9 }
  0x77   :  { %1259 = shalt.err (!%p1256_p13)
}
  0x78   :  { %73 = dma.hbm_to_vmem [thread:$0]  %s1889_s4, 16, %s71_s29, [#allocation9]  }
  0x79   :  { %s1349_s28 = smov [#allocation13]   ;;  %s1350_s11 = smov [#allocation16]  }
  0x7a   :  { %s92_s30 = sshll.u32 %s1349_s28, 4  ;;  %s112_s13 = sshll.u32 %s1350_s11, 4  ;;  %s93_s30 = int_to_ptr.vmem [resolvable:$true] %s92_s30  ;;  %s113_s13 = int_to_ptr.vmem [resolvable:$true] %s112_s13 }
  0x7b   :  { %s1260_s10 = scalar_lea.hbm %s1891_s6, 16 }
  0x7c   :  { %p1261_p0 = scmp.ne.s32.totalorder %s1891_s6, %s1260_s10  ;;  %p1264_p1 = scmp.lt.u32.totalorder %s1260_s10, %s1891_s6 }
  0x7e   :  { %p1266_p2 = pnand %p1264_p1, %p1261_p0 }
  0x80   :  { %1269 = shalt.err (!%p1266_p2)
}
  0x81   :  { %s1270_s4 = scalar_lea.vmem %s93_s30, 16  ;;  %s1274_s29 = scalar_lea.vmem %s93_s30, 32 }
  0x82   :  { %p1271_p3 = scmp.ne.s32.totalorder %s93_s30, %s1270_s4  ;;  %p1275_p4 = scmp.lt.s32.totalorder %s93_s30, %s93_s30 }
  0x83   :  { %p1276_p5 = scmp.lt.s32.totalorder %s1274_s29, %s1270_s4 }
  0x85   :  { %p1277_p6 = por %p1276_p5, %p1275_p4 }
  0x87   :  { %p1278_p7 = pnand %p1277_p6, %p1271_p3 }
  0x89   :  { %1281 = shalt.err (!%p1278_p7)
}
  0x8a   :  { %95 = dma.hbm_to_vmem [thread:$0]  %s1891_s6, 16, %s93_s30, [#allocation12]  }
  0x8b   :  { %s1282_s23 = scalar_lea.hbm %s1893_s8, 16 }
  0x8c   :  { %p1283_p8 = scmp.ne.s32.totalorder %s1893_s8, %s1282_s23  ;;  %p1286_p9 = scmp.lt.u32.totalorder %s1282_s23, %s1893_s8 }
  0x8e   :  { %p1288_p10 = pnand %p1286_p9, %p1283_p8 }
  0x90   :  { %1291 = shalt.err (!%p1288_p10)
}
  0x91   :  { %s1292_s26 = scalar_lea.vmem %s113_s13, 16  ;;  %s1296_s2 = scalar_lea.vmem %s113_s13, 32 }
  0x92   :  { %p1293_p11 = scmp.ne.s32.totalorder %s113_s13, %s1292_s26  ;;  %p1297_p12 = scmp.lt.s32.totalorder %s113_s13, %s113_s13 }
  0x93   :  { %p1298_p13 = scmp.lt.s32.totalorder %s1296_s2, %s1292_s26 }
  0x95   :  { %p1299_p0 = por %p1298_p13, %p1297_p12 }
  0x97   :  { %p1300_p1 = pnand %p1299_p0, %p1293_p11 }
  0x99   :  { %1303 = shalt.err (!%p1300_p1)
}
  0x9a   :  { %115 = dma.hbm_to_vmem [thread:$0]  %s1893_s8, 16, %s113_s13, [#allocation15]  }
  0x9b   :  { %1326 = dma.done.wait [#allocation3], 512  }
  0x9c   :  { %1327 = vsyncadd [#allocation3], 4294966784 }
  0x9d   :  { %1328 = dma.done.wait [#allocation6], 80  }
  0x9e   :  { %1329 = vsyncadd [#allocation6], 4294967216 }
  0x9f   :  { %1330 = dma.done.wait [#allocation9], 400  }
  0xa0   :  { %1331 = vsyncadd [#allocation9], 4294966896 }
  0xa1   :  { %1332 = dma.done.wait [#allocation12], 656  }
  0xa2   :  { %1333 = vsyncadd [#allocation12], 4294966640 }
  0xa3   :  { %1334 = dma.done.wait [#allocation15], 80  }
  0xa4   :  { %1335 = vsyncadd [#allocation15], 4294967216  ;;  %vm218_vm0 = vcmask 1043456   ;;  %v203_v0 = vld [vmem:[#allocation5] sm:$0xf]  ;;  %v1532_v2 = vld [vmem:[#allocation2 + $0x8] sm:$0xff]  ;;  %v148_v25 = vlaneseq }
  0xa5   :  { %v1530_v1 = vld [vmem:[#allocation2] sm:$0xff]  ;;  %vm211_vm1 = vcmask 64512   ;;  %1016 = vmatprep.subr.msk.bf16.mxu0 %vm218_vm0, %v203_v0  ;;  %v220_v3 = vsel %vm218_vm0, %v203_v0, 0  ;;  %v1538_v5 = vld [vmem:[#allocation2 + $0x10] sm:$0xff]  ;;  %v1540_v6 = vld [vmem:[#allocation2 + $0x18] sm:$0xff]  ;;  %s1351_s8 = smov 96  }
  0xa6   :  { %v201_v4 = vpack.c.bf16 %v1532_v2, %v1530_v1  ;;  %981 = vmatpush3.bf16.msra.mxu0 %v220_v3  ;;  %v202_v7 = vpack.c.bf16 %v1540_v6, %v1538_v5  ;;  %v942_v8 = vld [vmem:[#allocation7] ss:$0 sm:$0xff]  ;;  %s1352_s28 = smov 112   ;;  %v1098_v23 = vld [vmem:[#allocation8] sm:$0xff]   ;;  %v1558_v26 = vshrl.u32 %v148_v25, 7  ;;  %v1100_v49 = vld [vmem:[#allocation8 + $0x8] sm:$0xff]  }
  0xa7   :  { %v1099_v24 = vld [vmem:[#allocation11] sm:$0xff]   ;;  %986 = vmatprep.subr.bf16.mxu1 %v1098_v23  ;;  %v1101_v50 = vld [vmem:[#allocation11 + $0x8] sm:$0xff]   ;;  %v1102_v56 = vld [vmem:[#allocation8 + $0x10] sm:$0xff]   ;;  %s1353_s30 = smov 16   ;;  %s1354_s11 = smov 32   ;;  %vm373_vm14 = vcmask 130048  }
  0xa8   :  { %982 = vmatprep.mubr.msk.bf16.mxu0 %vm211_vm1, %v201_v4  ;;  %996 = vmatprep.subr.bf16.mxu0 %v1099_v24  ;;  %v1561_v27 = vadd.s32 24, %v1558_v26  ;;  %v150_v28 = vadd.s32 8, %v1558_v26  ;;  %v157_v29 = vand.u32 15, %v1558_v26  ;;  %v1567_v32 = vadd.s32 16, %v1558_v26  ;;  %v1103_v57 = vld [vmem:[#allocation11 + $0x10] sm:$0xff]   ;;  %s1355_s13 = smov 48  }
  0xa9   :  { %983 = vmatmul.mubr.msk.bf16.vlgmr.msra.gmra.mrb[0].mxu0 %vm211_vm1, %v202_v7  ;;  %987 = vmatpush3.bf16.msra.mxu1 %v1098_v23  ;;  %vm295_vm2 = vcmp.lt.s32.totalorder %v1558_v26, 1  ;;  %vm328_vm4 = vcmp.lt.s32.totalorder %v1558_v26, 7  ;;  %vm549_vm8 = vcmp.lt.s32.totalorder %v1558_v26, 6  ;;  %vm492_vm9 = vcmp.lt.s32.totalorder %v1558_v26, 2  ;;  %s1357_s14 = smov [#allocation17]  }
  0xaa   :  { %997 = vmatpush3.bf16.msra.mxu0 %v1099_v24  ;;  %v178_v30 = vand.u32 15, %v1561_v27  ;;  %v164_v31 = vand.u32 15, %v150_v28  ;;  %vm1574_vm3 = vcmp.ge.s32.totalorder %v157_v29, 1  ;;  %v171_v43 = vand.u32 15, %v1567_v32  ;;  %988 = vmatprep.subr.bf16.mxu1 %v1100_v49  ;;  %s926_s5 = sshll.u32 %s1357_s14, 4  ;;  %s927_s5 = int_to_ptr.vmem [resolvable:$true] %s926_s5 }
  0xab   :  { %998 = vmatprep.subr.bf16.mxu0 %v1101_v50  ;;  %vm1628_vm11 = vcmp.ge.s32.totalorder %v157_v29, 2  ;;  %vm378_vm15 = vcmask 261120   ;;  %s1304_s10 = scalar_lea.vmem %s927_s5, 512  ;;  %p1309_p3 = scmp.lt.s32.totalorder %s927_s5, %s927_s5 }
  0xac   :  { %vm1582_vm5 = vcmp.le.s32.totalorder %v178_v30, 14  ;;  %vm1586_vm6 = vcmp.le.s32.totalorder %v164_v31, 14  ;;  %vm1614_vm7 = vcmp.ge.s32.totalorder %v171_v43, 1  ;;  %vm1624_vm10 = vcmp.le.s32.totalorder %v164_v31, 13  ;;  %p1305_p2 = scmp.ne.s32.totalorder %s927_s5, %s1304_s10  ;;  %p1310_p4 = scmp.lt.s32.totalorder %s1304_s10, %s1304_s10 }
  0xad   :  { %989 = vmatpush3.bf16.msra.mxu1 %v1100_v49  ;;  %vm1687_vm12 = vcmp.le.s32.totalorder %v178_v30, 13  ;;  %vm1710_vm13 = vcmp.ge.s32.totalorder %v171_v43, 2 }
  0xae   :  { %999 = vmatpush3.bf16.msra.mxu0 %v1101_v50  ;;  %990 = vmatprep.subr.bf16.mxu1 %v1102_v56  ;;  %p1311_p5 = por %p1310_p4, %p1309_p3 }
  0xaf   :  { %1000 = vmatprep.subr.bf16.mxu0 %v1103_v57 }
  0xb0   :  { %p1312_p6 = pnand %p1311_p5, %p1305_p2 }
  0xb1   :  { %991 = vmatpush3.bf16.msra.mxu1 %v1102_v56 }
  0xb2   :  { %1001 = vmatpush3.bf16.msra.mxu0 %v1103_v57 }
 0x17c   :  { %v984_v9 = vpop.f32.mrb[0].mxu0 }
 0x17d   :  { %v256_v10 = vpop.f32.mrb[1].mxu0  ;;  %v265_v11 = vadd.f32 %v984_v9, %v942_v8 }
 0x17e   :  { %v257_v12 = vadd.f32 %v942_v8, %v256_v10  ;;  %v985_v13 = vpop.f32.mrb[2].mxu0 }
 0x17f   :  { %v268_v14 = vadd.f32 %v985_v13, %v942_v8  ;;  %v259_v15 = vpop.f32.mrb[3].mxu0  ;;  %v1550_v19 = vmax.f32 %v265_v11, 0.0 }
 0x180   :  { %v1546_v16 = vmax.f32 %v257_v12, 0.0  ;;  %v260_v17 = vadd.f32 %v942_v8, %v259_v15 }
 0x181   :  { %v1548_v18 = vmax.f32 %v268_v14, 0.0 }
 0x182   :  { %v1552_v20 = vmax.f32 %v260_v17, 0.0 }
 0x183   :  { %v1048_v21 = vpack.i.bf16 %v1548_v18, %v1546_v16 }
 0x184   :  { %v1038_v22 = vpack.i.bf16 %v1550_v19, %v1552_v20 }
 0x185   :  { %1049 = vrot.lane.b32.xlu1 %v1048_v21, %s1351_s8 }
 0x186   :  { %1039 = vrot.lane.b32.xlu0 %v1038_v22, %s1352_s28 }
 0x189   :  { %1054 = vrot.lane.b32.xlu1 %v1038_v22, %s1351_s8 }
 0x18a   :  { %1044 = vrot.lane.b32.xlu0 %v1048_v21, %s1352_s28 }
 0x1f7   :  { %v1050_v33 = vpop.permute.xlu1 %1049 }
 0x1f8   :  { %v1570_v34 = vunpack.i.h.bf16 %v1050_v33  ;;  %v1572_v35 = vunpack.i.l.bf16 %v1050_v33  ;;  %v1040_v36 = vpop.permute.xlu0 %1039 }
 0x1f9   :  { %v1042_v37 = vunpack.i.h.bf16 %v1040_v36  ;;  %v1041_v38 = vunpack.i.l.bf16 %v1040_v36 }
 0x1fa   :  { %v524_v40 = vrot.slane %v1570_v34, 7  ;;  %v491_v51 = vrot.slane %v1570_v34, 6  ;;  %v521_v55 = vrot.slane %v1572_v35, 7  ;;  %v488_v58 = vrot.slane %v1572_v35, 6 }
 0x1fb   :  { %v293_v44 = vrot.slane %v1042_v37, 7  ;;  %v326_v45 = vrot.slane %v1042_v37, 1  ;;  %v1591_v46 = vrot.slane %v1041_v38, 7  ;;  %v325_v47 = vrot.slane %v1041_v38, 1  ;;  %v1055_v48 = vpop.permute.xlu1 %1054 }
 0x1fc   :  { %v1594_v52 = vunpack.i.h.bf16 %v1055_v48  ;;  %v1596_v53 = vunpack.i.l.bf16 %v1055_v48  ;;  %v1045_v54 = vpop.permute.xlu0 %1044  ;;  %v533_v62 = vrot.slane %v1572_v35, 1  ;;  %v528_v0 = vsel %vm295_vm2, %v524_v40, %v521_v55 }
 0x1fd   :  { %v1603_v59 = vsel %vm295_vm2, %v1591_v46, %v293_v44  ;;  %v1047_v60 = vunpack.i.h.bf16 %v1045_v54  ;;  %v1046_v61 = vunpack.i.l.bf16 %v1045_v54  ;;  %v536_v3 = vrot.slane %v1570_v34, 1 }
 0x1fe   :  { %v522_v63 = vrot.slane %v1596_v53, 7  ;;  %v330_v10 = vsel %vm328_vm4, %v325_v47, %v326_v45  ;;  %v490_v13 = vrot.slane %v1594_v52, 6  ;;  %v529_v15 = vsel %vm1574_vm3, %v528_v0, 0.0 }
 0x1ff   :  { %v1620_v7 = vrot.slane %v1047_v60, 7  ;;  %v327_v8 = vrot.slane %v1047_v60, 1  ;;  %v324_v9 = vrot.slane %v1046_v61, 1  ;;  %v535_v17 = vrot.slane %v1594_v52, 1 }
 0x200   :  { %v527_v14 = vsel %vm295_vm2, %v521_v55, %v522_v63  ;;  %v540_v31 = vsel %vm328_vm4, %v536_v3, %v533_v62  ;;  %v489_v33 = vrot.slane %v1596_v53, 6  ;;  %v354_v37 = vsel %vm1586_vm6, %v330_v10, 0.0 }
 0x201   :  { %v1641_v21 = vsel %vm295_vm2, %v293_v44, %v1620_v7  ;;  %v1063_v22 = vpack.i.bf16 %v527_v14, %v529_v15  ;;  %v329_v23 = vsel %vm328_vm4, %v326_v45, %v327_v8  ;;  %v332_v24 = vsel %vm328_vm4, %v327_v8, %v324_v9  ;;  %v1104_v44 = vld [vmem:[#allocation11 + $0x18] sm:$0xff]   ;;  %v1105_v8 = vld [vmem:[#allocation11 + $0x20] sm:$0xff]  }
 0x202   :  { %v356_v25 = vsel %vm1582_vm5, %v332_v24, 0.0  ;;  %v331_v28 = vsel %vm328_vm4, %v324_v9, %v325_v47  ;;  %v537_v29 = vsel %vm328_vm4, %v535_v17, %v536_v3  ;;  %v534_v38 = vrot.slane %v1596_v53, 1  ;;  %1002 = vmatprep.subr.bf16.mxu0 %v1104_v44  ;;  %v1683_v9 = vld [vmem:[#allocation14] sm:$0xf] }
 0x203   :  { %1064 = vrot.lane.b32.xlu0 %v1063_v22, %s1353_s30  ;;  %v1058_v36 = vpack.i.bf16 %v356_v25, %v329_v23  ;;  %v291_v45 = vrot.slane %v1046_v61, 7  ;;  %v1073_v47 = vpack.i.bf16 %v354_v37, %v331_v28  ;;  %v544_v48 = vsel %vm1582_vm5, %v540_v31, 0.0  ;;  %1003 = vmatpush3.bf16.msra.mxu0 %v1104_v44 }
 0x204   :  { %v523_v49 = vrot.slane %v1594_v52, 7  ;;  %v1068_v50 = vpack.i.bf16 %v544_v48, %v537_v29  ;;  %v538_v54 = vsel %vm328_vm4, %v534_v38, %v535_v17  ;;  %v546_v55 = vrot.slane %v1596_v53, 2  ;;  %1017 = vmatprep.subr.msk.bf16.mxu1 %vm218_vm0, %v1683_v9  ;;  %1004 = vmatprep.subr.bf16.mxu0 %v1105_v8 }
 0x205   :  { %1059 = vrot.lane.b32.xlu1 %v1058_v36, %s1354_s11  ;;  %v547_v56 = vrot.slane %v1594_v52, 2  ;;  %v539_v57 = vsel %vm328_vm4, %v533_v62, %v534_v38  ;;  %v542_v60 = vsel %vm1586_vm6, %v538_v54, 0.0  ;;  %v545_v0 = vrot.slane %v1572_v35, 2 }
 0x206   :  { %v526_v61 = vsel %vm295_vm2, %v522_v63, %v523_v49  ;;  %v525_v53 = vsel %vm295_vm2, %v523_v49, %v524_v40  ;;  %v548_v3 = vrot.slane %v1570_v34, 2  ;;  %v1083_v40 = vpack.i.bf16 %v542_v60, %v539_v57 }
 0x207   :  { %1074 = vrot.lane.b32.xlu0 %v1073_v47, %s1354_s11  ;;  %v531_v52 = vsel %vm1614_vm7, %v526_v61, 0.0  ;;  %v551_v62 = vsel %vm549_vm8, %v546_v55, %v547_v56  ;;  %v1698_v10 = vsel %vm492_vm9, %v488_v58, %v489_v33  ;;  %v1706_v27 = vsel %vm492_vm9, %v491_v51, %v488_v58  ;;  %1005 = vmatpush3.bf16.msra.mxu0 %v1105_v8 }
 0x208   :  { %v1078_v14 = vpack.i.bf16 %v525_v53, %v531_v52  ;;  %v552_v15 = vsel %vm549_vm8, %v545_v0, %v546_v55  ;;  %v575_v35 = vsel %vm1624_vm10, %v551_v62, 0.0  ;;  %v517_v17 = vsel %vm1628_vm11, %v1706_v27, 0.0 }
 0x209   :  { %1069 = vrot.lane.b32.xlu1 %v1068_v50, %s1355_s13  ;;  %v553_v32 = vsel %vm549_vm8, %v548_v3, %v545_v0  ;;  %v1728_v43 = vsel %vm492_vm9, %v490_v13, %v491_v51  ;;  %v1732_v58 = vsel %vm492_vm9, %v489_v33, %v490_v13  ;;  %v298_v11 = vsel %vm295_vm2, %v291_v45, %v1591_v46 }
 0x20a   :  { %v550_v22 = vsel %vm549_vm8, %v547_v56, %v548_v3  ;;  %v519_v23 = vsel %vm1710_vm13, %v1732_v58, 0.0  ;;  %v299_v34 = vsel %vm295_vm2, %v1620_v7, %v291_v45  ;;  %v1088_v51 = vpack.i.bf16 %v575_v35, %v552_v15 }
 0x20b   :  { %1084 = vrot.lane.b32.xlu0 %v1083_v40, %s1355_s13  ;;  %v577_v13 = vsel %vm1687_vm12, %v553_v32, 0.0  ;;  %v752_v24 = vrot.slane %v1530_v1, 7  ;;  %v755_v25 = vrot.slane %v1540_v6, 7  ;;  %v753_v28 = vrot.slane %v1532_v2, 7 }
 0x20c   :  { %v1093_v46 = vpack.i.bf16 %v577_v13, %v550_v22  ;;  %v754_v29 = vrot.slane %v1538_v5, 7  ;;  %v768_v7 = vrot.slane %v1530_v1, 1  ;;  %v769_v31 = vrot.slane %v1532_v2, 1 }
 0x20d   :  { %1079 = vrot.lane.b32.xlu1 %v1078_v14, %s1353_s30  ;;  %v759_v33 = vsel %vm295_vm2, %v755_v25, %v752_v24  ;;  %v771_v36 = vrot.slane %v1540_v6, 1  ;;  %v770_v37 = vrot.slane %v1538_v5, 1  ;;  %v758_v44 = vsel %vm295_vm2, %v752_v24, %v753_v28 }
 0x20e   :  { %v757_v38 = vsel %vm295_vm2, %v753_v28, %v754_v29  ;;  %v760_v45 = vsel %vm1574_vm3, %v759_v33, -inf  ;;  %v756_v47 = vsel %vm295_vm2, %v754_v29, %v755_v25  ;;  %v322_v50 = vsel %vm1614_vm7, %v1603_v59, 0.0 }
 0x20f   :  { %1089 = vrot.lane.b32.xlu0 %v1088_v51, %s1340_s1  ;;  %v775_v48 = vsel %vm328_vm4, %v771_v36, %v768_v7  ;;  %v773_v49 = vsel %vm328_vm4, %v769_v31, %v770_v37  ;;  %v762_v54 = vsel %vm1614_vm7, %v757_v38, -inf  ;;  %v765_v55 = vmax.f32 %v758_v44, %v1532_v2 }
 0x210   :  { %v764_v56 = vmax.f32 %v760_v45, %v1530_v1  ;;  %v767_v60 = vmax.f32 %v756_v47, %v1540_v6  ;;  %v779_v61 = vsel %vm1582_vm5, %v775_v48, -inf  ;;  %v777_v0 = vsel %vm1586_vm6, %v773_v49, -inf }
 0x211   :  { %1094 = vrot.lane.b32.xlu1 %v1093_v46, %s1340_s1  ;;  %v774_v59 = vsel %vm328_vm4, %v768_v7, %v769_v31  ;;  %v766_v4 = vmax.f32 %v762_v54, %v1538_v5  ;;  %v772_v53 = vsel %vm328_vm4, %v770_v37, %v771_v36  ;;  %v376_v1 = vsel %vm373_vm14, %v322_v50, %v1550_v19  ;;  %s1356_s1 = smov 80  }
 0x212   :  { %v377_v6 = vsel %vm373_vm14, %v1641_v21, %v1548_v18  ;;  %v320_v52 = vsel %vm1574_vm3, %v299_v34, 0.0  ;;  %v780_v8 = vmax.f32 %v764_v56, %v774_v59  ;;  %v781_v26 = vmax.f32 %v765_v55, %v777_v0 }
 0x213   :  { %v783_v35 = vmax.f32 %v767_v60, %v779_v61  ;;  %v374_v21 = vsel %vm373_vm14, %v320_v52, %v1546_v16  ;;  %v375_v39 = vsel %vm373_vm14, %v298_v11, %v1552_v20  ;;  %v782_v34 = vmax.f32 %v766_v4, %v772_v53  ;;  %v945_v53 = vld [vmem:[#allocation10] ss:$0 sm:$0xff] }
 0x214   :  { %vm416_vm2 = vcmask 392192   ;;  %v784_v25 = vpack.c.bf16 %v781_v26, %v780_v8  ;;  %v801_v11 = vsel %vm218_vm0, %v1683_v9, 0  ;;  %vm638_vm3 = vcmask 523264  }
 0x215   :  { %vm692_vm4 = vcmask 654336   ;;  %vm916_vm0 = vcmask 785408  }
 0x275   :  { %v1065_v57 = vpop.permute.xlu0 %1064 }
 0x276   :  { %v1067_v62 = vunpack.i.h.bf16 %v1065_v57  ;;  %v1066_v3 = vunpack.i.l.bf16 %v1065_v57 }
 0x277   :  { %v1060_v2 = vpop.permute.xlu1 %1059 }
 0x278   :  { %v1062_v41 = vunpack.i.h.bf16 %v1060_v2  ;;  %v1061_v42 = vunpack.i.l.bf16 %v1060_v2  ;;  %v627_v28 = vsel %vm373_vm14, %v1698_v10, %v1067_v62  ;;  %v626_v29 = vsel %vm373_vm14, %v517_v17, %v1066_v3 }
 0x279   :  { %v1075_v5 = vpop.permute.xlu0 %1074  ;;  %v785_v10 = vpack.c.bf16 %v783_v35, %v782_v34  ;;  %v630_v27 = vsel %vm378_vm15, %v626_v29, %v1546_v16  ;;  %v631_v9 = vsel %vm378_vm15, %v627_v28, %v1552_v20  ;;  %v959_v34 = vld [vmem:[#allocation16] ss:$0 sm:$0xff] }
 0x27a   :  { %v382_v63 = vsel %vm378_vm15, %v377_v6, %v1062_v41  ;;  %v381_v40 = vsel %vm378_vm15, %v376_v1, %v1061_v42  ;;  %v1077_v14 = vunpack.i.h.bf16 %v1075_v5  ;;  %v1076_v15 = vunpack.i.l.bf16 %v1075_v5 }
 0x27b   :  { %v384_v32 = vpack.c.bf16 %v382_v63, %v381_v40  ;;  %v1070_v22 = vpop.permute.xlu1 %1069  ;;  %v951_v63 = vld [vmem:[#allocation13] ss:$0 sm:$0xff] }
 0x27c   :  { %v379_v51 = vsel %vm378_vm15, %v374_v21, %v1076_v15  ;;  %v380_v13 = vsel %vm378_vm15, %v375_v39, %v1077_v14  ;;  %v1072_v12 = vunpack.i.h.bf16 %v1070_v22  ;;  %v1071_v38 = vunpack.i.l.bf16 %v1070_v22 }
 0x27d   :  { %v1085_v46 = vpop.permute.xlu0 %1084  ;;  %v383_v24 = vpack.c.bf16 %v380_v13, %v379_v51 }
 0x27e   :  { %v1087_v7 = vunpack.i.h.bf16 %v1085_v46  ;;  %v1086_v31 = vunpack.i.l.bf16 %v1085_v46 }
 0x27f   :  { %v1080_v33 = vpop.permute.xlu1 %1079  ;;  %992 = vmatprep.mubr.msk.bf16.mxu1 %vm416_vm2, %v383_v24 }
 0x280   :  { %v1082_v36 = vunpack.i.h.bf16 %v1080_v33  ;;  %v1081_v37 = vunpack.i.l.bf16 %v1080_v33  ;;  %993 = vmatmul.mubr.msk.bf16.vlgmr.msra.gmra.mrb[0].mxu1 %vm416_vm2, %v384_v32  ;;  %v635_v49 = vsel %vm416_vm2, %v631_v9, %v1087_v7  ;;  %v634_v50 = vsel %vm416_vm2, %v630_v27, %v1086_v31 }
 0x281   :  { %v1090_v17 = vpop.permute.xlu0 %1089  ;;  %1011 = vmatpush3.bf16.msra.mxu1 %v801_v11  ;;  %1012 = vmatprep.mubr.msk.bf16.mxu1 %vm211_vm1, %v784_v25 }
 0x282   :  { %v629_v44 = vsel %vm373_vm14, %v1728_v43, %v1082_v36  ;;  %v628_v45 = vsel %vm373_vm14, %v519_v23, %v1081_v37  ;;  %v1092_v47 = vunpack.i.h.bf16 %v1090_v17  ;;  %v1091_v48 = vunpack.i.l.bf16 %v1090_v17 }
 0x283   :  { %v633_v54 = vsel %vm378_vm15, %v629_v44, %v1548_v18  ;;  %v632_v55 = vsel %vm378_vm15, %v628_v45, %v1550_v19  ;;  %v1095_v56 = vpop.permute.xlu1 %1094 }
 0x284   :  { %v639_v43 = vsel %vm638_vm3, %v634_v50, %v1091_v48  ;;  %v640_v30 = vsel %vm638_vm3, %v635_v49, %v1092_v47  ;;  %v1097_v58 = vunpack.i.h.bf16 %v1095_v56  ;;  %v1096_v57 = vunpack.i.l.bf16 %v1095_v56 }
 0x285   :  { %v643_v23 = vpack.c.bf16 %v640_v30, %v639_v43  ;;  %v636_v60 = vsel %vm416_vm2, %v632_v55, %v1071_v38  ;;  %v637_v61 = vsel %vm416_vm2, %v633_v54, %v1072_v12 }
 0x286   :  { %v641_v0 = vsel %vm638_vm3, %v636_v60, %v1096_v57  ;;  %v642_v59 = vsel %vm638_vm3, %v637_v61, %v1097_v58 }
 0x287   :  { %v644_v4 = vpack.c.bf16 %v642_v59, %v641_v0  ;;  %1006 = vmatprep.mubr.msk.bf16.mxu0 %vm692_vm4, %v643_v23 }
 0x288   :  { %1013 = vmatmul.mubr.msk.bf16.vlgmr.msra.gmra.mrb[4].mxu1 %vm211_vm1, %v785_v10 }
 0x289   :  { %1007 = vmatmul.mubr.msk.bf16.vlgmr.msra.gmra.mrb[4].mxu0 %vm692_vm4, %v644_v4 }
 0x353   :  { %v994_v1 = vpop.f32.mrb[0].mxu1 }
 0x354   :  { %v466_v2 = vadd.f32 %v994_v1, %v945_v53  ;;  %v457_v6 = vpop.f32.mrb[1].mxu1 }
 0x355   :  { %v995_v41 = vpop.f32.mrb[2].mxu1  ;;  %v458_v52 = vadd.f32 %v945_v53, %v457_v6 }
 0x356   :  { %v474_v42 = vmax.f32 %v466_v2, 0.0  ;;  %v469_v62 = vadd.f32 %v995_v41, %v945_v53  ;;  %v460_v3 = vpop.f32.mrb[3].mxu1 }
 0x357   :  { %v461_v8 = vadd.f32 %v945_v53, %v460_v3  ;;  %v472_v26 = vmax.f32 %v458_v52, 0.0 }
 0x358   :  { %v475_v5 = vmax.f32 %v469_v62, 0.0  ;;  %864 = vrot.lane.b32.xlu0 %v474_v42, %s1353_s30 }
 0x359   :  { %v473_v14 = vmax.f32 %v461_v8, 0.0 }
 0x35a   :  { %866 = vrot.lane.b32.xlu1 %v475_v5, %s1353_s30 }
 0x35b   :  { %v1014_v40 = vpop.f32.mrb[4].mxu1 }
 0x35c   :  { %v1008_v15 = vpop.f32.mrb[4].mxu0  ;;  %860 = vrot.lane.b32.xlu0 %v472_v26, %s1353_s30  ;;  %v837_v35 = vpop.f32.mrb[5].mxu1  ;;  %v846_v37 = vadd.f32 %v1014_v40, %v959_v34 }
 0x35d   :  { %v742_v32 = vadd.f32 %v1008_v15, %v951_v63  ;;  %v733_v22 = vpop.f32.mrb[5].mxu0  ;;  %v1015_v21 = vpop.f32.mrb[6].mxu1  ;;  %v838_v11 = vadd.f32 %v959_v34, %v837_v35 }
 0x35e   :  { %v1009_v39 = vpop.f32.mrb[6].mxu0  ;;  %862 = vrot.lane.b32.xlu1 %v473_v14, %s1353_s30  ;;  %v840_v51 = vpop.f32.mrb[7].mxu1  ;;  %v734_v46 = vadd.f32 %v951_v63, %v733_v22  ;;  %v849_v10 = vadd.f32 %v1015_v21, %v959_v34  ;;  %v854_v38 = vmax.f32 %v846_v37, 0.0 }
 0x35f   :  { %v750_v13 = vmax.f32 %v742_v32, 0.0  ;;  %v745_v24 = vadd.f32 %v1009_v39, %v951_v63  ;;  %v736_v25 = vpop.f32.mrb[7].mxu0  ;;  %v852_v33 = vmax.f32 %v838_v11, 0.0  ;;  %v841_v36 = vadd.f32 %v959_v34, %v840_v51 }
 0x360   :  { %v737_v29 = vadd.f32 %v951_v63, %v736_v25  ;;  %v748_v7 = vmax.f32 %v734_v46, 0.0  ;;  %v855_v27 = vmax.f32 %v849_v10, 0.0 }
 0x361   :  { %v751_v28 = vmax.f32 %v745_v24, 0.0  ;;  %880 = vrot.lane.b32.xlu0 %v750_v13, %s1355_s13  ;;  %v853_v12 = vmax.f32 %v841_v36, 0.0 }
 0x362   :  { %v749_v31 = vmax.f32 %v737_v29, 0.0 }
 0x363   :  { %882 = vrot.lane.b32.xlu1 %v751_v28, %s1355_s13 }
 0x365   :  { %876 = vrot.lane.b32.xlu0 %v748_v7, %s1355_s13 }
 0x367   :  { %878 = vrot.lane.b32.xlu1 %v749_v31, %s1355_s13 }
 0x369   :  { %892 = vrot.lane.b32.xlu0 %v852_v33, %s1356_s1 }
 0x36b   :  { %894 = vrot.lane.b32.xlu1 %v853_v12, %s1356_s1 }
 0x36d   :  { %896 = vrot.lane.b32.xlu0 %v854_v38, %s1356_s1 }
 0x36f   :  { %898 = vrot.lane.b32.xlu1 %v855_v27, %s1356_s1 }
 0x3ca   :  { %v865_v9 = vpop.permute.xlu0 %864 }
 0x3cb   :  { %v906_v23 = vsel %vm373_vm14, %v1550_v19, %v865_v9 }
 0x3cc   :  { %v867_v17 = vpop.permute.xlu1 %866 }
 0x3ce   :  { %v861_v44 = vpop.permute.xlu0 %860 }
 0x3cf   :  { %v904_v54 = vsel %vm373_vm14, %v1546_v16, %v861_v44 }
 0x3d0   :  { %v863_v45 = vpop.permute.xlu1 %862 }
 0x3d1   :  { %v905_v43 = vsel %vm373_vm14, %v1552_v20, %v863_v45  ;;  %v907_v20 = vsel %vm373_vm14, %v1548_v18, %v867_v17 }
 0x3d3   :  { %v881_v47 = vpop.permute.xlu0 %880 }
 0x3d4   :  { %v910_v16 = vsel %vm416_vm2, %v906_v23, %v881_v47 }
 0x3d5   :  { %v883_v48 = vpop.permute.xlu1 %882 }
 0x3d6   :  { %v911_v59 = vsel %vm416_vm2, %v907_v20, %v883_v48 }
 0x3d7   :  { %v877_v49 = vpop.permute.xlu0 %876 }
 0x3d8   :  { %v908_v55 = vsel %vm416_vm2, %v904_v54, %v877_v49 }
 0x3d9   :  { %v879_v50 = vpop.permute.xlu1 %878 }
 0x3da   :  { %v909_v58 = vsel %vm416_vm2, %v905_v43, %v879_v50 }
 0x3db   :  { %v893_v56 = vpop.permute.xlu0 %892 }
 0x3dc   :  { %v912_v30 = vsel %vm692_vm4, %v908_v55, %v893_v56 }
 0x3dd   :  { %917 = vst.msk [vmem:[#allocation17] sm:$0xff] %vm916_vm0, %v912_v30  ;;  %v895_v57 = vpop.permute.xlu1 %894 }
 0x3de   :  { %v913_v60 = vsel %vm692_vm4, %v909_v58, %v895_v57 }
 0x3df   :  { %918 = vst.msk [vmem:[#allocation17 + $0x8] sm:$0xff] %vm916_vm0, %v913_v60  ;;  %v897_v61 = vpop.permute.xlu0 %896 }
 0x3e0   :  { %v914_v0 = vsel %vm692_vm4, %v910_v16, %v897_v61 }
 0x3e1   :  { %919 = vst.msk [vmem:[#allocation17 + $0x10] sm:$0xff] %vm916_vm0, %v914_v0  ;;  %v899_v4 = vpop.permute.xlu1 %898 }
 0x3e2   :  { %v915_v19 = vsel %vm692_vm4, %v911_v59, %v899_v4 }
 0x3e3   :  { %920 = vst.msk [vmem:[#allocation17 + $0x18] sm:$0xff] %vm916_vm0, %v915_v19 }
 0x3e4   :  { %1315 = shalt.err (!%p1312_p6)
}
 0x3e5   :  { %s1316_s16 = scalar_lea.hbm %s1894_s9, 512 }
 0x3e6   :  { %p1317_p7 = scmp.ne.s32.totalorder %s1894_s9, %s1316_s16  ;;  %p1320_p8 = scmp.lt.u32.totalorder %s1316_s16, %s1894_s9 }
 0x3e8   :  { %p1322_p9 = pnand %p1320_p8, %p1317_p7 }
 0x3ea   :  { %1325 = shalt.err (!%p1322_p9)
}
 0x3eb   :  { %932 = dma.vmem_to_hbm [thread:$0]  %s927_s5, 512, %s1894_s9, [#allocation4], %s1345_s7, %s1345_s7, %s1346_s17  }
 0x3ec   :  { %1336 = dma.done.wait [#allocation4], 512  }
 0x3ed   :  { %1337 = vsyncadd [#allocation4], 4294966784 }
 0x3ee   :  { %936 = vsyncpa [#allocation3], 1 }
 0x3ef   :  { %937 = vsyncpa [#allocation6], 1 }
 0x3f0   :  { %938 = vsyncpa [#allocation9], 1 }
 0x3f1   :  { %939 = vsyncpa [#allocation12], 1 }
 0x3f2   :  { %940 = vsyncpa [#allocation15], 1 }
 0x3f3   :  { %941 = vsyncpa [#allocation4], 1 }

</bundles_post_ra>
